<compile_context>
chip_gen: v5e
topology: v5e:2x2
jax: 0.10.0
libtpu: 0.0.40
codegen_flags: <defaults>
</compile_context>

<pallas_src>
import functools

import jax
import jax.numpy as jnp
from jax.experimental import pallas as pl
from jax.experimental.pallas import tpu as pltpu


# ------------------------------ Pallas kernel ------------------------------

def graphsage_fused_kernel(a_ref, x_ref, p_ref, w1_ref, b1_ref, w2_ref, b2_ref,
                           wlin_ref, blin_ref, out_ref, h1_ref, acc_ref,
                           *, tile_m, a_resident):
    """Fused 2-layer SAGEConv + global_mean_pool + Linear.

    Grid = (layer in {0,1}, row-tile i).  Per step:
      layer 0: h1[tile] = relu([A_tile@X | X_tile] @ W1 + b1)      (written to VMEM scratch)
      layer 1: h2_tile  = relu([A_tile@h1 | h1_tile] @ W2 + b2)
               acc     += P_tile @ h2_tile
               (last step) out = sum(acc * wlin, lanes) + blin

    a_ref   : (N_pad, N_pad) bf16 if resident else (TM, N_pad) bf16 row tile
    x_ref   : (N_pad, Din_pad=128) bf16  resident
    p_ref   : (G_pad, TM)          f32   pooling-matrix column tile
    w1_ref  : (2*Din_pad, H_pad)   bf16  vstack([W1_l, W1_r])
    b1_ref  : (1, H_pad)           f32
    w2_ref  : (2*H_pad, H_pad)     bf16  vstack([W2_l, W2_r])
    b2_ref  : (1, H_pad)           f32
    wlin_ref: (1, H_pad)           f32   final linear weight (lane-dense row)
    blin_ref: (1, 1)               f32
    out_ref : (G_pad, 1)           f32
    h1_ref  : (N_pad, H_pad)       bf16  VMEM scratch (layer-1 output, all nodes)
    acc_ref : (G_pad, H_pad)       f32   VMEM scratch (pooled accumulator)
    """
    layer = pl.program_id(0)
    i = pl.program_id(1)
    row0 = pl.multiple_of(i * tile_m, tile_m)

    # Row tile of the mean-aggregation matrix (slice the resident copy, or take the
    # streamed block as-is).
    if a_resident:
        a_tile = a_ref[pl.ds(row0, tile_m), :]
    else:
        a_tile = a_ref[...]

    @pl.when(layer == 0)
    def _layer1():
        # Neighbourhood mean on the MXU (bf16 operands, f32 accumulation).
        agg = jnp.dot(a_tile, x_ref[...], preferred_element_type=jnp.float32)
        # Fused lin_l / lin_r: lane-dense K = 2*128 = 256 single MXU launch.
        feats = jnp.concatenate(
            [agg.astype(jnp.bfloat16), x_ref[pl.ds(row0, tile_m), :]], axis=-1)
        h = jnp.dot(feats, w1_ref[...],
                    preferred_element_type=jnp.float32) + b1_ref[...]
        h1_ref[pl.ds(row0, tile_m), :] = jnp.maximum(h, 0.0).astype(h1_ref.dtype)

    @pl.when(layer == 1)
    def _layer2_and_pool():
        @pl.when(i == 0)
        def _init():
            acc_ref[...] = jnp.zeros_like(acc_ref)

        agg = jnp.dot(a_tile, h1_ref[...], preferred_element_type=jnp.float32)
        feats = jnp.concatenate(
            [agg.astype(jnp.bfloat16), h1_ref[pl.ds(row0, tile_m), :]], axis=-1)
        h2 = jnp.maximum(
            jnp.dot(feats, w2_ref[...],
                    preferred_element_type=jnp.float32) + b2_ref[...],
            0.0)

        # global_mean_pool: accumulate P_tile @ h2_tile (f32) -- h2 never hits HBM.
        acc_ref[...] += jnp.dot(p_ref[...], h2,
                                preferred_element_type=jnp.float32)

        @pl.when(i == pl.num_programs(1) - 1)
        def _finalize():
            # Linear(H -> 1) as a lane reduction (VPU/XLU), not a 1-column MXU matmul.
            out_ref[...] = (jnp.sum(acc_ref[...] * wlin_ref[...],
                                    axis=-1, keepdims=True)
                            + blin_ref[...])


# ------------------------------ wrapper ------------------------------

def _round_up(v, m):
    return ((v + m - 1) // m) * m


def _vmem_budget_bytes():
    """~75% of the generation's physical per-core VMEM (headroom for Mosaic scratch)."""
    phys = 64 * 1024 * 1024  # conservative default = v7x per-TensorCore VMEM
    try:
        info = pltpu.get_tpu_info()
        phys = int(getattr(info, "vmem_capacity_bytes", phys))
    except Exception:
        pass
    return int(phys * 3 // 4)


def _plan_tiling(n_pad, din_pad, h_pad, g_pad, budget, max_tile_m):
    """Decide (a_resident, tile_m) from a conservative VMEM budget."""
    fixed = (2 * n_pad * din_pad * 2                      # X bf16 (2 buffers, conservative)
             + n_pad * h_pad * 2                          # h1 scratch bf16
             + g_pad * h_pad * 4                          # pooled accumulator f32
             + 2 * (2 * din_pad + 2 * h_pad) * h_pad * 2  # fused W1 + W2 bf16 (2 buffers)
             + 2 * 3 * h_pad * 4                          # b1, b2, wlin f32 (2 buffers)
             + 2 * g_pad * 4 + 8192)                      # output + slack

    def best_tile(extra_fixed, per_row_bytes):
        t_best, t = 0, 128
        while t <= min(max_tile_m, n_pad):
            if n_pad % t == 0 and fixed + extra_fixed + 2 * t * per_row_bytes <= budget:
                t_best = t
            t += 128
        return t_best

    # Option 1: A fully resident in VMEM (read from HBM once for both layers).
    t = best_tile(2 * n_pad * n_pad * 2, g_pad * 4)
    if t:
        return True, t
    # Option 2: stream A as (tile_m, n_pad) bf16 row tiles (double-buffered).
    t = best_tile(0, n_pad * 2 + g_pad * 4)
    return False, (t or 128)


def graphsage_forward(x, adj_mean, pool_mat, params, *, hidden_dim=64, max_tile_m=512):
    """GraphSAGE forward: relu(SAGE1) -> relu(SAGE2) -> global_mean_pool -> Linear."""
    (w1l, b1l, w1r, w2l, b2l, w2r, wlin, blin) = params
    n, in_dim = x.shape
    g = pool_mat.shape[0]

    din_pad = _round_up(max(in_dim, 1), 128)   # lane-dense X, K=256 fused matmul
    h_pad = _round_up(max(hidden_dim, 1), 128)
    n_pad = _round_up(n, 128)                  # row/contraction pad to 128 only (linear waste)
    g_pad = _round_up(max(g, 1), 8)

    budget = _vmem_budget_bytes()
    a_resident, tile_m = _plan_tiling(n_pad, din_pad, h_pad, g_pad, budget, max_tile_m)
    n_tiles = n_pad // tile_m

    # ---- pad graph operators / features (zero rows & cols are inert) ----
    x_p = jnp.zeros((n_pad, din_pad), jnp.float32).at[:n, :in_dim].set(x)
    a_p = jnp.zeros((n_pad, n_pad), jnp.float32).at[:n, :n].set(adj_mean)
    p_p = jnp.zeros((g_pad, n_pad), jnp.float32).at[:g, :n].set(pool_mat)

    # ---- fused (vstacked) + lane-padded parameters ----
    w1s = jnp.zeros((2 * din_pad, h_pad), jnp.float32)
    w1s = w1s.at[:in_dim, :hidden_dim].set(w1l)
    w1s = w1s.at[din_pad:din_pad + in_dim, :hidden_dim].set(w1r)
    b1p = jnp.zeros((1, h_pad), jnp.float32).at[:, :hidden_dim].set(b1l)

    w2s = jnp.zeros((2 * h_pad, h_pad), jnp.float32)
    w2s = w2s.at[:hidden_dim, :hidden_dim].set(w2l)
    w2s = w2s.at[h_pad:h_pad + hidden_dim, :hidden_dim].set(w2r)
    b2p = jnp.zeros((1, h_pad), jnp.float32).at[:, :hidden_dim].set(b2l)

    wlin_row = jnp.zeros((1, h_pad), jnp.float32).at[:, :hidden_dim].set(wlin[:, 0])
    blin_p = blin.reshape(1, 1).astype(jnp.float32)

    # ---- bf16 MXU operands (halves HBM/VMEM traffic of the O(N^2) A matrix) ----
    a_bf = a_p.astype(jnp.bfloat16)
    x_bf = x_p.astype(jnp.bfloat16)
    w1_bf = w1s.astype(jnp.bfloat16)
    w2_bf = w2s.astype(jnp.bfloat16)

    if a_resident:
        a_spec = pl.BlockSpec((n_pad, n_pad), lambda l, i: (0, 0))       # resident, one HBM read
    else:
        a_spec = pl.BlockSpec((tile_m, n_pad), lambda l, i: (i, 0))      # streamed row tiles

    kernel = functools.partial(graphsage_fused_kernel,
                               tile_m=tile_m, a_resident=a_resident)

    out = pl.pallas_call(
        kernel,
        out_shape=jax.ShapeDtypeStruct((g_pad, 1), jnp.float32),
        grid_spec=pltpu.PrefetchScalarGridSpec(
            num_scalar_prefetch=0,
            grid=(2, n_tiles),                                           # (layer, row tile)
            in_specs=[
                a_spec,
                pl.BlockSpec((n_pad, din_pad), lambda l, i: (0, 0)),     # X, resident
                pl.BlockSpec((g_pad, tile_m), lambda l, i: (0, i)),      # P column tile
                pl.BlockSpec((2 * din_pad, h_pad), lambda l, i: (0, 0)),  # fused W1
                pl.BlockSpec((1, h_pad), lambda l, i: (0, 0)),           # b1
                pl.BlockSpec((2 * h_pad, h_pad), lambda l, i: (0, 0)),   # fused W2
                pl.BlockSpec((1, h_pad), lambda l, i: (0, 0)),           # b2
                pl.BlockSpec((1, h_pad), lambda l, i: (0, 0)),           # wlin row
                pl.BlockSpec((1, 1), lambda l, i: (0, 0)),               # blin
            ],
            out_specs=pl.BlockSpec((g_pad, 1), lambda l, i: (0, 0)),
            scratch_shapes=[
                pltpu.VMEM((n_pad, h_pad), jnp.bfloat16),   # h1 (all nodes, never hits HBM)
                pltpu.VMEM((g_pad, h_pad), jnp.float32),    # pooled accumulator
            ],
        ),
        compiler_params=pltpu.CompilerParams(
            # Cross-step state (h1 scratch, pooled accumulator) => both axes arbitrary.
            dimension_semantics=("arbitrary", "arbitrary"),
            vmem_limit_bytes=budget,
        ),
    )(a_bf, x_bf, p_p, w1_bf, b1p, w2_bf, b2p, wlin_row, blin_p)

    return out[:g]


# ------------------- JAX glue (graph -> dense operators) -------------------

def build_mean_adj(edge_index, num_nodes):
    """A[i, j] = 1/deg_in(i) if edge (j -> i), else 0 (PyG SAGEConv 'mean' aggregation)."""
    src, dst = edge_index[0], edge_index[1]
    a = jnp.zeros((num_nodes, num_nodes), jnp.float32).at[dst, src].add(1.0)
    deg = a.sum(axis=1, keepdims=True)
    return a / jnp.maximum(deg, 1.0)


def build_pool_mat(batch, num_graphs):
    """P[g, i] = 1/|V_g| if batch[i] == g, else 0 (global_mean_pool)."""
    p = (batch[None, :] == jnp.arange(num_graphs)[:, None]).astype(jnp.float32)
    return p / jnp.maximum(p.sum(axis=1, keepdims=True), 1.0)


def init_params(key, in_dim, hidden_dim):
    ks = jax.random.split(key, 8)

    def uni(k, shape, fan_in):
        bound = 1.0 / jnp.sqrt(float(fan_in))
        return jax.random.uniform(k, shape, jnp.float32, -bound, bound)

    w1l = uni(ks[0], (in_dim, hidden_dim), in_dim)
    b1l = uni(ks[1], (1, hidden_dim), in_dim)
    w1r = uni(ks[2], (in_dim, hidden_dim), in_dim)
    w2l = uni(ks[3], (hidden_dim, hidden_dim), hidden_dim)
    b2l = uni(ks[4], (1, hidden_dim), hidden_dim)
    w2r = uni(ks[5], (hidden_dim, hidden_dim), hidden_dim)
    wlin = uni(ks[6], (hidden_dim, 1), hidden_dim)
    blin = uni(ks[7], (1, 1), hidden_dim)
    return (w1l, b1l, w1r, w2l, b2l, w2r, wlin, blin)


def reference_forward(x, adj_mean, pool_mat, params):
    """Pure-JAX reference mirroring the kernel's bf16 operand quantisation."""
    (w1l, b1l, w1r, w2l, b2l, w2r, wlin, blin) = params
    q = lambda t: t.astype(jnp.bfloat16).astype(jnp.float32)
    mm = functools.partial(jnp.dot, precision=jax.lax.Precision.HIGHEST)

    aq, xq = q(adj_mean), q(x)
    agg1 = q(mm(aq, xq))
    h1 = jnp.maximum(mm(agg1, q(w1l)) + b1l + mm(xq, q(w1r)), 0.0)
    h1q = q(h1)
    agg2 = q(mm(aq, h1q))
    h2 = jnp.maximum(mm(agg2, q(w2l)) + b2l + mm(h1q, q(w2r)), 0.0)
    pooled = mm(pool_mat, h2)
    return mm(pooled, wlin) + blin


if __name__ == "__main__":
    key = jax.random.PRNGKey(0)
    k_feat, k_pos, k_edge, k_param = jax.random.split(key, 4)

    # Small synthetic QM9-like batch: 2 molecules, 16 atoms each.
    num_nodes = 32
    num_graphs = 2
    num_features = 11                    # QM9 node features
    in_dim = num_features + 3            # cat([data.x, data.pos], dim=1)
    hidden_dim = 64
    num_edges = 64

    node_feat = jax.random.normal(k_feat, (num_nodes, num_features), jnp.float32)
    pos = jax.random.normal(k_pos, (num_nodes, 3), jnp.float32)
    x = jnp.concatenate([node_feat, pos], axis=1)             # [N, 14]

    # Random directed edges kept within each graph.
    e0, e1 = jax.random.split(k_edge)
    src_a = jax.random.randint(e0, (num_edges // 2,), 0, num_nodes // 2)
    dst_a = jax.random.randint(e1, (num_edges // 2,), 0, num_nodes // 2)
    src_b = src_a + num_nodes // 2
    dst_b = dst_a + num_nodes // 2
    edge_index = jnp.stack([jnp.concatenate([src_a, src_b]),
                            jnp.concatenate([dst_a, dst_b])], axis=0)   # [2, E]

    batch = jnp.concatenate([jnp.zeros(num_nodes // 2, jnp.int32),
                             jnp.ones(num_nodes // 2, jnp.int32)])

    adj_mean = build_mean_adj(edge_index, num_nodes)          # [N, N]
    pool_mat = build_pool_mat(batch, num_graphs)              # [G, N]
    params = init_params(k_param, in_dim, hidden_dim)

    out = graphsage_forward(x, adj_mean, pool_mat, params, hidden_dim=hidden_dim)
    out = jax.block_until_ready(out)

    ref = reference_forward(x, adj_mean, pool_mat, params)
    assert out.shape == (num_graphs, 1)
    assert jnp.allclose(out, ref, atol=1e-3, rtol=1e-3), (out, ref)

    print("KERNEL_OK")
</pallas_src>

<mosaic_0001>
module attributes {stable_mosaic.version = 11 : i64} {
  func.func @graphsage_fused_kernel(%arg0: i32, %arg1: i32, %arg2: memref<128x128xbf16, #tpu.memory_space<vmem>>, %arg3: memref<128x128xbf16, #tpu.memory_space<vmem>>, %arg4: memref<8x128xf32, #tpu.memory_space<vmem>>, %arg5: memref<256x128xbf16, #tpu.memory_space<vmem>>, %arg6: memref<1x128xf32, #tpu.memory_space<vmem>>, %arg7: memref<256x128xbf16, #tpu.memory_space<vmem>>, %arg8: memref<1x128xf32, #tpu.memory_space<vmem>>, %arg9: memref<1x128xf32, #tpu.memory_space<vmem>>, %arg10: memref<1x1xf32, #tpu.memory_space<vmem>>, %arg11: memref<8x1xf32, #tpu.memory_space<vmem>>, %arg12: memref<128x128xbf16, #tpu.memory_space<vmem>>, %arg13: memref<8x128xf32, #tpu.memory_space<vmem>>) attributes {dimension_semantics = [#tpu.dimension_semantics<arbitrary>, #tpu.dimension_semantics<arbitrary>], iteration_bounds = array<i64: 2, 1>, scalar_prefetch = 0 : i64, scratch_operands = 2 : i64, tpu.core_type = #tpu.core_type<tc>, window_params = [{pipeline_mode = #tpu.pipeline_mode<synchronous>, transform_indices = @transform_0, window_bounds = array<i64: 128, 128>}, {pipeline_mode = #tpu.pipeline_mode<synchronous>, transform_indices = @transform_1, window_bounds = array<i64: 128, 128>}, {transform_indices = @transform_2, window_bounds = array<i64: 8, 128>}, {pipeline_mode = #tpu.pipeline_mode<synchronous>, transform_indices = @transform_3, window_bounds = array<i64: 256, 128>}, {pipeline_mode = #tpu.pipeline_mode<synchronous>, transform_indices = @transform_4, window_bounds = array<i64: 1, 128>}, {pipeline_mode = #tpu.pipeline_mode<synchronous>, transform_indices = @transform_5, window_bounds = array<i64: 256, 128>}, {pipeline_mode = #tpu.pipeline_mode<synchronous>, transform_indices = @transform_6, window_bounds = array<i64: 1, 128>}, {pipeline_mode = #tpu.pipeline_mode<synchronous>, transform_indices = @transform_7, window_bounds = array<i64: 1, 128>}, {pipeline_mode = #tpu.pipeline_mode<synchronous>, transform_indices = @transform_8, window_bounds = array<i64: 1, 1>}, {pipeline_mode = #tpu.pipeline_mode<synchronous>, transform_indices = @transform_9, window_bounds = array<i64: 8, 1>}]} {
    %c128_i32 = arith.constant 128 : i32
    %0 = arith.muli %arg1, %c128_i32 : i32
    %1 = tpu.assume_multiple %0, 128 : i32
    %2 = arith.index_cast %1 : i32 to index
    %c0 = arith.constant 0 : index
    %3 = vector.load %arg2[%2, %c0] : memref<128x128xbf16, #tpu.memory_space<vmem>>, vector<128x128xbf16>
    %c0_i32 = arith.constant 0 : i32
    %4 = arith.cmpi eq, %arg0, %c0_i32 : i32
    %5 = arith.extui %4 : i1 to i32
    %c0_i32_0 = arith.constant 0 : i32
    %6 = arith.cmpi ne, %5, %c0_i32_0 : i32
    scf.if %6 {
      %c0_2 = arith.constant 0 : index
      %c0_3 = arith.constant 0 : index
      %10 = vector.load %arg3[%c0_2, %c0_3] : memref<128x128xbf16, #tpu.memory_space<vmem>>, vector<128x128xbf16>
      %cst = arith.constant dense<0.000000e+00> : vector<128x128xf32>
      %11 = tpu.matmul %3, %10, %cst {dimension_numbers = #tpu.dot_dimension_numbers<[1], [0], [0], [1], [0, 0, 1, 1], [], []>} : vector<128x128xbf16>, vector<128x128xbf16>, vector<128x128xf32> -> vector<128x128xf32>
      %12 = arith.truncf %11 : vector<128x128xf32> to vector<128x128xbf16>
      %13 = arith.index_cast %1 : i32 to index
      %c0_4 = arith.constant 0 : index
      %14 = vector.load %arg3[%13, %c0_4] : memref<128x128xbf16, #tpu.memory_space<vmem>>, vector<128x128xbf16>
      %15 = tpu.concatenate %12, %14 in 1 : vector<128x128xbf16>, vector<128x128xbf16> -> vector<128x256xbf16>
      %c0_5 = arith.constant 0 : index
      %c0_6 = arith.constant 0 : index
      %16 = vector.load %arg5[%c0_5, %c0_6] : memref<256x128xbf16, #tpu.memory_space<vmem>>, vector<256x128xbf16>
      %cst_7 = arith.constant dense<0.000000e+00> : vector<128x128xf32>
      %17 = tpu.matmul %15, %16, %cst_7 {dimension_numbers = #tpu.dot_dimension_numbers<[1], [0], [0], [1], [0, 0, 1, 1], [], []>} : vector<128x256xbf16>, vector<256x128xbf16>, vector<128x128xf32> -> vector<128x128xf32>
      %c0_8 = arith.constant 0 : index
      %c0_9 = arith.constant 0 : index
      %18 = vector.load %arg6[%c0_8, %c0_9] : memref<1x128xf32, #tpu.memory_space<vmem>>, vector<1x128xf32>
      %19 = vector.broadcast %18 : vector<1x128xf32> to vector<128x128xf32>
      %20 = arith.addf %17, %19 : vector<128x128xf32>
      %cst_10 = arith.constant 0.000000e+00 : f32
      %21 = vector.broadcast %cst_10 : f32 to vector<128x128xf32>
      %22 = arith.maximumf %20, %21 : vector<128x128xf32>
      %23 = arith.truncf %22 : vector<128x128xf32> to vector<128x128xbf16>
      %24 = arith.index_cast %1 : i32 to index
      %c0_11 = arith.constant 0 : index
      %25 = vector.load %arg12[%24, %c0_11] : memref<128x128xbf16, #tpu.memory_space<vmem>>, vector<128x128xbf16>
      tpu.vector_store %arg12[%24, %c0_11], %23 {strides = array<i32>} : memref<128x128xbf16, #tpu.memory_space<vmem>>, vector<128x128xbf16>,
    } else {
    }
    %c1_i32 = arith.constant 1 : i32
    %7 = arith.cmpi eq, %arg0, %c1_i32 : i32
    %8 = arith.extui %7 : i1 to i32
    %c0_i32_1 = arith.constant 0 : i32
    %9 = arith.cmpi ne, %8, %c0_i32_1 : i32
    scf.if %9 {
      %c0_i32_2 = arith.constant 0 : i32
      %10 = arith.cmpi eq, %arg1, %c0_i32_2 : i32
      %11 = arith.extui %10 : i1 to i32
      %c0_i32_3 = arith.constant 0 : i32
      %12 = arith.cmpi ne, %11, %c0_i32_3 : i32
      scf.if %12 {
        %cst_22 = arith.constant 0.000000e+00 : f32
        %34 = vector.broadcast %cst_22 : f32 to vector<8x128xf32>
        %c0_23 = arith.constant 0 : index
        %c0_24 = arith.constant 0 : index
        %35 = vector.load %arg13[%c0_23, %c0_24] : memref<8x128xf32, #tpu.memory_space<vmem>>, vector<8x128xf32>
        tpu.vector_store %arg13[%c0_23, %c0_24], %34 {strides = array<i32>} : memref<8x128xf32, #tpu.memory_space<vmem>>, vector<8x128xf32>,
      } else {
      }
      %c0_4 = arith.constant 0 : index
      %c0_5 = arith.constant 0 : index
      %13 = vector.load %arg12[%c0_4, %c0_5] : memref<128x128xbf16, #tpu.memory_space<vmem>>, vector<128x128xbf16>
      %cst = arith.constant dense<0.000000e+00> : vector<128x128xf32>
      %14 = tpu.matmul %3, %13, %cst {dimension_numbers = #tpu.dot_dimension_numbers<[1], [0], [0], [1], [0, 0, 1, 1], [], []>} : vector<128x128xbf16>, vector<128x128xbf16>, vector<128x128xf32> -> vector<128x128xf32>
      %15 = arith.truncf %14 : vector<128x128xf32> to vector<128x128xbf16>
      %16 = arith.index_cast %1 : i32 to index
      %c0_6 = arith.constant 0 : index
      %17 = vector.load %arg12[%16, %c0_6] : memref<128x128xbf16, #tpu.memory_space<vmem>>, vector<128x128xbf16>
      %18 = tpu.concatenate %15, %17 in 1 : vector<128x128xbf16>, vector<128x128xbf16> -> vector<128x256xbf16>
      %c0_7 = arith.constant 0 : index
      %c0_8 = arith.constant 0 : index
      %19 = vector.load %arg7[%c0_7, %c0_8] : memref<256x128xbf16, #tpu.memory_space<vmem>>, vector<256x128xbf16>
      %cst_9 = arith.constant dense<0.000000e+00> : vector<128x128xf32>
      %20 = tpu.matmul %18, %19, %cst_9 {dimension_numbers = #tpu.dot_dimension_numbers<[1], [0], [0], [1], [0, 0, 1, 1], [], []>} : vector<128x256xbf16>, vector<256x128xbf16>, vector<128x128xf32> -> vector<128x128xf32>
      %c0_10 = arith.constant 0 : index
      %c0_11 = arith.constant 0 : index
      %21 = vector.load %arg8[%c0_10, %c0_11] : memref<1x128xf32, #tpu.memory_space<vmem>>, vector<1x128xf32>
      %22 = vector.broadcast %21 : vector<1x128xf32> to vector<128x128xf32>
      %23 = arith.addf %20, %22 : vector<128x128xf32>
      %cst_12 = arith.constant 0.000000e+00 : f32
      %24 = vector.broadcast %cst_12 : f32 to vector<128x128xf32>
      %25 = arith.maximumf %23, %24 : vector<128x128xf32>
      %c0_13 = arith.constant 0 : index
      %c0_14 = arith.constant 0 : index
      %26 = vector.load %arg13[%c0_13, %c0_14] : memref<8x128xf32, #tpu.memory_space<vmem>>, vector<8x128xf32>
      %c0_15 = arith.constant 0 : index
      %c0_16 = arith.constant 0 : index
      %27 = vector.load %arg4[%c0_15, %c0_16] : memref<8x128xf32, #tpu.memory_space<vmem>>, vector<8x128xf32>
      %cst_17 = arith.constant dense<0.000000e+00> : vector<8x128xf32>
      %28 = tpu.matmul %27, %25, %cst_17 {dimension_numbers = #tpu.dot_dimension_numbers<[1], [0], [0], [1], [0, 0, 1, 1], [], []>} : vector<8x128xf32>, vector<128x128xf32>, vector<8x128xf32> -> vector<8x128xf32>
      %29 = arith.addf %26, %28 : vector<8x128xf32>
      %c0_18 = arith.constant 0 : index
      %c0_19 = arith.constant 0 : index
      %30 = vector.load %arg13[%c0_18, %c0_19] : memref<8x128xf32, #tpu.memory_space<vmem>>, vector<8x128xf32>
      tpu.vector_store %arg13[%c0_18, %c0_19], %29 {strides = array<i32>} : memref<8x128xf32, #tpu.memory_space<vmem>>, vector<8x128xf32>,
      %c0_i32_20 = arith.constant 0 : i32
      %31 = arith.cmpi eq, %arg1, %c0_i32_20 : i32
      %32 = arith.extui %31 : i1 to i32
      %c0_i32_21 = arith.constant 0 : i32
      %33 = arith.cmpi ne, %32, %c0_i32_21 : i32
      scf.if %33 {
        %c0_22 = arith.constant 0 : index
        %c0_23 = arith.constant 0 : index
        %34 = vector.load %arg13[%c0_22, %c0_23] : memref<8x128xf32, #tpu.memory_space<vmem>>, vector<8x128xf32>
        %c0_24 = arith.constant 0 : index
        %c0_25 = arith.constant 0 : index
        %35 = vector.load %arg9[%c0_24, %c0_25] : memref<1x128xf32, #tpu.memory_space<vmem>>, vector<1x128xf32>
        %36 = vector.broadcast %35 : vector<1x128xf32> to vector<8x128xf32>
        %37 = arith.mulf %34, %36 : vector<8x128xf32>
        %cst_26 = arith.constant dense<0.000000e+00> : vector<8xf32>
        %38 = vector.multi_reduction <add>, %37, %cst_26 [1] : vector<8x128xf32> to vector<8xf32>
        %39 = vector.shape_cast %38 : vector<8xf32> to vector<8x1xf32>
        %c0_27 = arith.constant 0 : index
        %c0_28 = arith.constant 0 : index
        %40 = vector.load %arg10[%c0_27, %c0_28] : memref<1x1xf32, #tpu.memory_space<vmem>>, vector<1x1xf32>
        %41 = vector.broadcast %40 : vector<1x1xf32> to vector<8x1xf32>
        %42 = arith.addf %39, %41 : vector<8x1xf32>
        %c0_29 = arith.constant 0 : index
        %c0_30 = arith.constant 0 : index
        %43 = vector.load %arg11[%c0_29, %c0_30] : memref<8x1xf32, #tpu.memory_space<vmem>>, vector<8x1xf32>
        tpu.vector_store %arg11[%c0_29, %c0_30], %42 {strides = array<i32>} : memref<8x1xf32, #tpu.memory_space<vmem>>, vector<8x1xf32>,
      } else {
      }
    } else {
    }
    return
  }
  func.func @transform_0(%arg0: i32, %arg1: i32) -> (i32, i32) {
    %c0_i32 = arith.constant 0 : i32
    %c0_i32_0 = arith.constant 0 : i32
    %c0_i32_1 = arith.constant 0 : i32
    return %c0_i32, %c0_i32_0 : i32, i32
  }
  func.func @transform_1(%arg0: i32, %arg1: i32) -> (i32, i32) {
    %c0_i32 = arith.constant 0 : i32
    %c0_i32_0 = arith.constant 0 : i32
    %c0_i32_1 = arith.constant 0 : i32
    return %c0_i32, %c0_i32_0 : i32, i32
  }
  func.func @transform_2(%arg0: i32, %arg1: i32) -> (i32, i32) {
    %c0_i32 = arith.constant 0 : i32
    %c0_i32_0 = arith.constant 0 : i32
    return %c0_i32, %arg1 : i32, i32
  }
  func.func @transform_3(%arg0: i32, %arg1: i32) -> (i32, i32) {
    %c0_i32 = arith.constant 0 : i32
    %c0_i32_0 = arith.constant 0 : i32
    %c0_i32_1 = arith.constant 0 : i32
    return %c0_i32, %c0_i32_0 : i32, i32
  }
  func.func @transform_4(%arg0: i32, %arg1: i32) -> (i32, i32) {
    %c0_i32 = arith.constant 0 : i32
    %c0_i32_0 = arith.constant 0 : i32
    %c0_i32_1 = arith.constant 0 : i32
    return %c0_i32, %c0_i32_0 : i32, i32
  }
  func.func @transform_5(%arg0: i32, %arg1: i32) -> (i32, i32) {
    %c0_i32 = arith.constant 0 : i32
    %c0_i32_0 = arith.constant 0 : i32
    %c0_i32_1 = arith.constant 0 : i32
    return %c0_i32, %c0_i32_0 : i32, i32
  }
  func.func @transform_6(%arg0: i32, %arg1: i32) -> (i32, i32) {
    %c0_i32 = arith.constant 0 : i32
    %c0_i32_0 = arith.constant 0 : i32
    %c0_i32_1 = arith.constant 0 : i32
    return %c0_i32, %c0_i32_0 : i32, i32
  }
  func.func @transform_7(%arg0: i32, %arg1: i32) -> (i32, i32) {
    %c0_i32 = arith.constant 0 : i32
    %c0_i32_0 = arith.constant 0 : i32
    %c0_i32_1 = arith.constant 0 : i32
    return %c0_i32, %c0_i32_0 : i32, i32
  }
  func.func @transform_8(%arg0: i32, %arg1: i32) -> (i32, i32) {
    %c0_i32 = arith.constant 0 : i32
    %c0_i32_0 = arith.constant 0 : i32
    %c0_i32_1 = arith.constant 0 : i32
    return %c0_i32, %c0_i32_0 : i32, i32
  }
  func.func @transform_9(%arg0: i32, %arg1: i32) -> (i32, i32) {
    %c0_i32 = arith.constant 0 : i32
    %c0_i32_0 = arith.constant 0 : i32
    %c0_i32_1 = arith.constant 0 : i32
    return %c0_i32, %c0_i32_0 : i32, i32
  }
}

</mosaic_0001>

<bundles_post_ra>
// kernel: tpu_custom_call.1
= control target key start
LH: loop header
LB: loop body
LE: loop exit
PB: predicated region body
PF: predicated region fallthrough
CT: control target
= control target key end

     0   :  { %s2715_s0 = inlined_call_operand.hbm [shape: bf16[128,128], index: 0, kind: input, shape index: {}]   ;;  %s2716_s1 = inlined_call_operand.hbm [shape: bf16[128,128], index: 1, kind: input, shape index: {}]   ;;  %s2717_s2 = inlined_call_operand.hbm [shape: f32[8,128], index: 2, kind: input, shape index: {}]   ;;  %s2718_s3 = inlined_call_operand.hbm [shape: bf16[256,128], index: 3, kind: input, shape index: {}]   ;;  %s2719_s4 = inlined_call_operand.vmem [shape: f32[1,128], index: 4, kind: input, shape index: {}]   ;;  %s2720_s5 = inlined_call_operand.hbm [shape: bf16[256,128], index: 5, kind: input, shape index: {}]   ;;  %s2721_s6 = inlined_call_operand.vmem [shape: f32[1,128], index: 6, kind: input, shape index: {}]   ;;  %s2722_s7 = inlined_call_operand.vmem [shape: f32[1,128], index: 7, kind: input, shape index: {}]   ;;  %s2723_s8 = inlined_call_operand.<no memory space> [shape: f32[1,1], index: 8, kind: input, shape index: {}]   ;;  %s2724_s9 = inlined_call_operand.vmem [shape: f32[8,1], index: 9, kind: output, shape index: {}]  }
   0x1   :  { %v14_v0 = vstv %s2723_s8 }
   0x2   :  { %15 = vst [vmem:[#allocation4] sm:$0x1] %v14_v0 }
   0x3   :  { %16 = vsyncpa [#allocation6], 0 }
   0x4   :  { %17 = vsyncpa [#allocation8], 0 }
   0x5   :  { %18 = vsyncpa [#allocation11], 0  ;;  %s2508_s11 = smov 0   ;;  %s2510_s12 = smov 0  }
   0x6   :  { %s2512_s13 = smov 0  }
   0x7 LB: > { %s1669_s8 = sadd.s32 4294967295, %s2446_s13   ;;  %p1670_p0 = scmp.ge.s32.totalorder %s2446_s13, 1  ;;  %s2446_s13 = sphi %s2512_s13, %s24_s13   ;;  %s2442_s12 = sphi %s2510_s12, %s2729_s12   ;;  %s2438_s11 = sphi %s2508_s11, %s2728_s11  }
   0x8   : > { %p256_p1 = scmp.lt.s32.totalorder %s2446_s13, 3  ;;  %p2526_p2 = scmp.eq.s32.totalorder %s1669_s8, 0 }
   0x9   : > { %s281_s17 = sshll.u32 %s2716_s1, 4  ;;  %s309_s21 = sshll.u32 %s2718_s3, 4  ;;  %s282_s17 = int_to_ptr.hbm [resolvable:$true] %s281_s17  ;;  %s310_s21 = int_to_ptr.hbm [resolvable:$true] %s309_s21 }
   0xa   : > { %p2533_p3 = pnand %p1670_p0, %p256_p1  ;;  %s2448_s22 = smov [#allocation7]  }
   0xb   : > { %s283_s23 = sshll.u32 %s2448_s22, 4  ;;  %s2449_s25 = smov [#allocation10]   ;;  %s284_s23 = int_to_ptr.vmem [resolvable:$true] %s283_s23 }
   0xc   : > { %p2201_p4 = pneg %p2533_p3  ;;  %s311_s26 = sshll.u32 %s2449_s25, 4  ;;  %s312_s26 = int_to_ptr.vmem [resolvable:$true] %s311_s26 }
   0xd   : > { %s2450_s27 = smov 64   ;;  %s2451_s28 = smov 4  }
   0xe   : > { %p2544_p5 = pnand %p2526_p2, %p2201_p4  ;;  %s267_s10 = sshll.u32 %s2715_s0, 4  ;;  %s268_s10 = int_to_ptr.hbm [resolvable:$true] %s267_s10 }
   0xf   : > { %s36_s8 = sadd.s32 1, %s2442_s12  ;;  %s2452_s15 = smov [#allocation5]  }
  0x10   : > { %2207 = dma.hbm_to_vmem [thread:$0]  (!%p2544_p5), %s282_s17, 1024, %s284_s23, [#allocation8], %s2450_s27, %s2450_s27, %s2451_s28  }
  0x11   : > { %2213 = dma.hbm_to_vmem [thread:$0]  (!%p2544_p5), %s310_s21, 2048, %s312_s26, [#allocation11], %s2450_s27, %s2450_s27, %s2451_s28  }
  0x12   : > { %p38_p6 = scmp.ge.s32.totalorder %s36_s8, 2  ;;  %s269_s16 = sshll.u32 %s2452_s15, 4  ;;  %s270_s16 = int_to_ptr.vmem [resolvable:$true] %s269_s16 }
  0x13   : > { %s298_s22 = sshll.u32 %s2717_s2, 4  ;;  %s326_s23 = sshll.u32 %s2720_s5, 4  ;;  %s299_s22 = int_to_ptr.hbm [resolvable:$true] %s298_s22  ;;  %s327_s23 = int_to_ptr.hbm [resolvable:$true] %s326_s23 }
  0x14   : > { %s2731_s8 = smov (%p38_p6, %s36_s8), 0  ;;  %s2453_s25 = smov [#allocation9]  }
  0x15   : > { %2204 = dma.hbm_to_vmem [thread:$0]  (!%p2544_p5), %s268_s10, 1024, %s270_s16, [#allocation6], %s2450_s27, %s2450_s27, %s2451_s28  }
  0x16   : > { %s300_s26 = sshll.u32 %s2453_s25, 4  ;;  %s2454_s29 = smov [#allocation12]   ;;  %s301_s26 = int_to_ptr.vmem [resolvable:$true] %s300_s26 }
  0x17   : > { %2210 = dma.hbm_to_vmem [thread:$0]  (!%p2544_p5), %s299_s22, 128, %s301_s26, [#allocation8]  }
  0x18   : > { %s328_s30 = sshll.u32 %s2454_s29, 4  ;;  %353 = sbr.rel (%p2533_p3) target bundleno = 1145 (0x479), region = 56  ;;  %s329_s30 = int_to_ptr.vmem [resolvable:$true] %s328_s30 }
  0x19   : > { %2216 = dma.hbm_to_vmem [thread:$0]  (!%p2544_p5), %s327_s23, 2048, %s329_s30, [#allocation11], %s2450_s27, %s2450_s27, %s2451_s28  }
  0x1d   : > { %2425 = dma.done.wait (%p2526_p2), [#allocation6], 1024  }
  0x1e   : > { %2427 = vsyncadd (%p2526_p2), [#allocation6], 4294966272 }
  0x1f   : > { %2429 = dma.done.wait (%p2526_p2), [#allocation8], 1152  }
  0x20   : > { %2431 = vsyncadd (%p2526_p2), [#allocation8], 4294966144 }
  0x21   : > { %2433 = dma.done.wait (%p2526_p2), [#allocation11], 4096  }
  0x22   : > { %2435 = vsyncadd (%p2526_p2), [#allocation11], 4294963200  ;;  %v2584_v1 = vld [vmem:[#allocation5] sm:$0xf]  ;;  %v2586_v3 = vld [vmem:[#allocation5] sm:$0xf0] }
  0x23   : > { %v1685_v2 = vld [vmem:[#allocation5] sm:$0xf]  ;;  %v2007_v4 = vld [vmem:[#allocation5] sm:$0xf0]  ;;  %v2588_v5 = vld [vmem:[#allocation5 + $0x8] sm:$0xf] }
  0x24   : > { %v1689_v6 = vld [vmem:[#allocation5 + $0x8] sm:$0xf]  ;;  %v2590_v7 = vld [vmem:[#allocation5 + $0x8] sm:$0xf0]  ;;  %v2592_v9 = vld [vmem:[#allocation5 + $0x10] sm:$0xf] }
  0x25   : > { %v2009_v8 = vld [vmem:[#allocation5 + $0x8] sm:$0xf0]  ;;  %v1693_v10 = vld [vmem:[#allocation5 + $0x10] sm:$0xf]  ;;  %v2594_v11 = vld [vmem:[#allocation5 + $0x10] sm:$0xf0] }
  0x26   : > { %v2011_v12 = vld [vmem:[#allocation5 + $0x10] sm:$0xf0]  ;;  %v2596_v13 = vld [vmem:[#allocation5 + $0x18] sm:$0xf]  ;;  %v2598_v15 = vld [vmem:[#allocation5 + $0x18] sm:$0xf0] }
  0x27   : > { %v1697_v14 = vld [vmem:[#allocation5 + $0x18] sm:$0xf]  ;;  %v2013_v16 = vld [vmem:[#allocation5 + $0x18] sm:$0xf0]  ;;  %v2600_v17 = vld [vmem:[#allocation5 + $0x20] sm:$0xf] }
  0x28   : > { %v2602_v18 = vld [vmem:[#allocation5 + $0x20] sm:$0xf]  ;;  %v2604_v19 = vld [vmem:[#allocation5 + $0x20] sm:$0xf0]  ;;  %v2608_v21 = vld [vmem:[#allocation5 + $0x28] sm:$0xf] }
  0x29   : > { %v2606_v20 = vld [vmem:[#allocation5 + $0x20] sm:$0xf0]  ;;  %v2610_v22 = vld [vmem:[#allocation5 + $0x28] sm:$0xf]  ;;  %v2612_v23 = vld [vmem:[#allocation5 + $0x28] sm:$0xf0] }
  0x2a   : > { %v2614_v24 = vld [vmem:[#allocation5 + $0x28] sm:$0xf0]  ;;  %v2616_v25 = vld [vmem:[#allocation5 + $0x30] sm:$0xf]  ;;  %v2618_v27 = vld [vmem:[#allocation5 + $0x30] sm:$0xf0] }
  0x2b   : > { %v1709_v26 = vld [vmem:[#allocation5 + $0x30] sm:$0xf]  ;;  %v2019_v28 = vld [vmem:[#allocation5 + $0x30] sm:$0xf0]  ;;  %v2620_v29 = vld [vmem:[#allocation5 + $0x38] sm:$0xf] }
  0x2c   : > { %v1713_v30 = vld [vmem:[#allocation5 + $0x38] sm:$0xf]  ;;  %v2622_v31 = vld [vmem:[#allocation5 + $0x38] sm:$0xf0]  ;;  %p1682_p7 = scmp.ne.s32.totalorder %s2438_s11, 0 }
  0x2d   : > { %v2021_v32 = vld [vmem:[#allocation5 + $0x38] sm:$0xf0] }
  0x2e   : > { %424 = sbr.rel (%p1682_p7) target bundleno = 446 (0x1be), region = 80 }
  0x33   : > { %v2029_v33 = vld [vmem:[#allocation7 + $0x38] sm:$0xff]  ;;  %v2028_v34 = vld [vmem:[#allocation7 + $0x30] sm:$0xff]  ;;  %v2027_v35 = vld [vmem:[#allocation7 + $0x28] sm:$0xff]  ;;  %v1686_v41 = vor.u32 %v2007_v4, %v1685_v2  ;;  %v1710_v42 = vor.u32 %v2019_v28, %v1709_v26  ;;  %v1690_v43 = vor.u32 %v2009_v8, %v1689_v6  ;;  %v1714_v44 = vor.u32 %v2021_v32, %v1713_v30 }
  0x34   : > { %537 = vmatpush.bf16.msra.mxu0 %v2029_v33  ;;  %2133 = vmatpush.bf16.msra.mxu3 %v2029_v33  ;;  %v2026_v36 = vld [vmem:[#allocation7 + $0x20] sm:$0xff]  ;;  %v2025_v37 = vld [vmem:[#allocation7 + $0x18] sm:$0xff]  ;;  %v2024_v38 = vld [vmem:[#allocation7 + $0x10] sm:$0xff]  ;;  %v1694_v45 = vor.u32 %v2011_v12, %v1693_v10  ;;  %v1698_v46 = vor.u32 %v2013_v16, %v1697_v14  ;;  %v1702_v55 = vor.u32 %v2606_v20, %v2602_v18 }
  0x35   : > { %v2023_v39 = vld [vmem:[#allocation7 + $0x8] sm:$0xff]  ;;  %v2022_v40 = vld [vmem:[#allocation7] sm:$0xff]  ;;  %v2052_v49 = vld [vmem:[#allocation10 + $0x70] sm:$0xff]  ;;  %v1706_v59 = vor.u32 %v2614_v24, %v2610_v22 }
  0x36   : > { %v2053_v47 = vld [vmem:[#allocation10 + $0x78] sm:$0xff]  ;;  %v2044_v50 = vld [vmem:[#allocation10 + $0x30] sm:$0xff]  ;;  %v2051_v51 = vld [vmem:[#allocation10 + $0x68] sm:$0xff] }
  0x37   : > { %v2045_v48 = vld [vmem:[#allocation10 + $0x38] sm:$0xff]  ;;  %897 = vmatpush.bf16.msra.mxu2 %v2053_v47  ;;  %v2043_v52 = vld [vmem:[#allocation10 + $0x28] sm:$0xff]  ;;  %v2050_v53 = vld [vmem:[#allocation10 + $0x60] sm:$0xff] }
  0x38   : > { %538 = vmatpush.bf16.msra.mxu0 %v2028_v34  ;;  %2134 = vmatpush.bf16.msra.mxu3 %v2028_v34  ;;  %v2042_v54 = vld [vmem:[#allocation10 + $0x20] sm:$0xff]  ;;  %v2049_v56 = vld [vmem:[#allocation10 + $0x58] sm:$0xff]  ;;  %v2048_v57 = vld [vmem:[#allocation10 + $0x50] sm:$0xff] }
  0x39   : > { %848 = vmatpush.bf16.msra.mxu1 %v2045_v48  ;;  %v2047_v58 = vld [vmem:[#allocation10 + $0x48] sm:$0xff]  ;;  %v2041_v60 = vld [vmem:[#allocation10 + $0x18] sm:$0xff]  ;;  %v2046_v61 = vld [vmem:[#allocation10 + $0x40] sm:$0xff] }
  0x3a   : > { %v2030_v62 = vld [vmem:[#allocation7] sm:$0xff]  ;;  %v2040_v63 = vld [vmem:[#allocation10 + $0x10] sm:$0xff]  ;;  %v2039_v0 = vld [vmem:[#allocation10 + $0x8] sm:$0xff] }
  0x3b   : > { %898 = vmatpush.bf16.msra.mxu2 %v2052_v49  ;;  %v2038_v2 = vld [vmem:[#allocation10] sm:$0xff]  ;;  %v2032_v8 = vld [vmem:[#allocation7 + $0x10] sm:$0xff]  ;;  %v2033_v34 = vld [vmem:[#allocation7 + $0x18] sm:$0xff] }
  0x3c   : > { %539 = vmatpush.bf16.msra.mxu0 %v2027_v35  ;;  %2135 = vmatpush.bf16.msra.mxu3 %v2027_v35  ;;  %v2031_v4 = vld [vmem:[#allocation7 + $0x8] sm:$0xff] }
  0x3d   : > { %849 = vmatpush.bf16.msra.mxu1 %v2044_v50 }
  0x3f   : > { %899 = vmatpush.bf16.msra.mxu2 %v2051_v51 }
  0x40   : > { %540 = vmatpush.bf16.msra.mxu0 %v2026_v36  ;;  %2136 = vmatpush.bf16.msra.mxu3 %v2026_v36 }
  0x41   : > { %850 = vmatpush.bf16.msra.mxu1 %v2043_v52 }
  0x43   : > { %900 = vmatpush.bf16.msra.mxu2 %v2050_v53 }
  0x44   : > { %541 = vmatpush.bf16.msra.mxu0 %v2025_v37  ;;  %2137 = vmatpush.bf16.msra.mxu3 %v2025_v37 }
  0x45   : > { %851 = vmatpush.bf16.msra.mxu1 %v2042_v54 }
  0x47   : > { %901 = vmatpush.bf16.msra.mxu2 %v2049_v56 }
  0x48   : > { %542 = vmatpush.bf16.msra.mxu0 %v2024_v38  ;;  %2138 = vmatpush.bf16.msra.mxu3 %v2024_v38 }
  0x49   : > { %852 = vmatpush.bf16.msra.mxu1 %v2041_v60 }
  0x4b   : > { %902 = vmatpush.bf16.msra.mxu2 %v2048_v57 }
  0x4c   : > { %543 = vmatpush.bf16.msra.mxu0 %v2023_v39  ;;  %2139 = vmatpush.bf16.msra.mxu3 %v2023_v39 }
  0x4d   : > { %853 = vmatpush.bf16.msra.mxu1 %v2040_v63 }
  0x4f   : > { %903 = vmatpush.bf16.msra.mxu2 %v2047_v58 }
  0x50   : > { %544 = vmatpush.bf16.msra.mxu0 %v2022_v40  ;;  %2140 = vmatpush.bf16.msra.mxu3 %v2022_v40 }
  0x51   : > { %854 = vmatpush.bf16.msra.mxu1 %v2039_v0 }
  0x53   : > { %545 = vmatmul.bf16.vlgmr.msra.gmra.mxu0 %v1686_v41  ;;  %575 = vmatmul.bf16.vlgmr.msra.gmra.mxu3 %v1710_v42 }
  0x54   : > { %2141 = vmatpush.bf16.msrb.mxu3 %v2045_v48  ;;  %904 = vmatpush.bf16.msra.mxu2 %v2046_v61 }
  0x55   : > { %855 = vmatpush.bf16.msra.mxu1 %v2038_v2 }
  0x57   : > { %905 = vmatmul.bf16.vlgmr.msra.gmra.mxu2 %v2030_v62 }
  0x58   : > { %2142 = vmatpush.bf16.msrb.mxu3 %v2044_v50 }
  0x5c   : > { %2143 = vmatpush.bf16.msrb.mxu3 %v2043_v52 }
  0x60   : > { %2144 = vmatpush.bf16.msrb.mxu3 %v2042_v54 }
  0x63   : > { %550 = vmatmul.bf16.gmra.mxu0 %v1690_v43  ;;  %580 = vmatmul.bf16.gmra.mxu3 %v1714_v44 }
  0x64   : > { %2145 = vmatpush.bf16.msrb.mxu3 %v2041_v60 }
  0x67   : > { %910 = vmatmul.bf16.gmra.mxu2 %v2031_v4 }
  0x68   : > { %2146 = vmatpush.bf16.msrb.mxu3 %v2040_v63 }
  0x6c   : > { %2147 = vmatpush.bf16.msrb.mxu3 %v2039_v0 }
  0x70   : > { %2148 = vmatpush.bf16.msrb.mxu3 %v2038_v2 }
  0x73   : > { %555 = vmatmul.bf16.gmra.mxu0 %v1694_v45 }
  0x74   : > { %2149 = vmatpush.bf16.msra.mxu3 %v2053_v47 }
  0x77   : > { %915 = vmatmul.bf16.gmra.mxu2 %v2032_v8 }
  0x78   : > { %2150 = vmatpush.bf16.msra.mxu3 %v2052_v49  ;;  %v2034_v49 = vld [vmem:[#allocation7 + $0x20] sm:$0xff] }
  0x7c   : > { %2151 = vmatpush.bf16.msra.mxu3 %v2051_v51 }
  0x80   : > { %2152 = vmatpush.bf16.msra.mxu3 %v2050_v53 }
  0x83   : > { %560 = vmatmul.bf16.gmra.mxu0 %v1698_v46 }
  0x84   : > { %2153 = vmatpush.bf16.msra.mxu3 %v2049_v56 }
  0x87   : > { %920 = vmatmul.bf16.gmra.mxu2 %v2033_v34 }
  0x88   : > { %2154 = vmatpush.bf16.msra.mxu3 %v2048_v57 }
  0x8c   : > { %2155 = vmatpush.bf16.msra.mxu3 %v2047_v58  ;;  %v2036_v58 = vld [vmem:[#allocation7 + $0x30] sm:$0xff] }
  0x90   : > { %2156 = vmatpush.bf16.msra.mxu3 %v2046_v61 }
  0x93   : > { %565 = vmatmul.bf16.gmra.mxu0 %v1702_v55 }
  0x97   : > { %925 = vmatmul.bf16.gmra.mxu2 %v2034_v49 }
  0xa3   : > { %570 = vmatmul.bf16.gmra.mxu0 %v1706_v59  ;;  %v2035_v59 = vld [vmem:[#allocation7 + $0x28] sm:$0xff] }
  0xa7   : > { %930 = vmatmul.bf16.gmra.mxu2 %v2035_v59 }
  0xd0   : > { %v546_v6 = vpop.f32.mrf.mxu0 }
  0xd1   : > { %v586_v12 = vpack.c.bf16 %v546_v6, %v546_v6  ;;  %v2037_v6 = vld [vmem:[#allocation7 + $0x38] sm:$0xff] }
  0xd3   : > { %v636_v18 = vunpack.c.l.b16 %v586_v12 }
  0xd6   : > { %v576_v10 = vpop.f32.mrf.mxu3 }
  0xd7   : > { %v598_v20 = vpack.c.bf16 %v576_v10, %v576_v10 }
  0xd8   : > { %v548_v14 = vpop.f32.mrf.mxu0 }
  0xd9   : > { %v587_v16 = vpack.c.bf16 %v548_v14, %v548_v14  ;;  %v648_v28 = vunpack.c.l.b16 %v598_v20 }
  0xdb   : > { %v637_v22 = vunpack.c.l.b16 %v587_v16 }
  0xdd   : > { %v652_v24 = vpack.c.b16 %v637_v22, %v636_v18 }
  0xde   : > { %v578_v26 = vpop.f32.mrf.mxu3 }
  0xdf   : > { %v599_v30 = vpack.c.bf16 %v578_v26, %v578_v26  ;;  %856 = vmatmul.bf16.vlgmr.msra.gmra.mxu1 %v652_v24 }
  0xe0   : > { %v551_v32 = vpop.f32.mrf.mxu0 }
  0xe1   : > { %v649_v33 = vunpack.c.l.b16 %v599_v30  ;;  %v588_v37 = vpack.c.bf16 %v551_v32, %v551_v32 }
  0xe3   : > { %v658_v35 = vpack.c.b16 %v649_v33, %v648_v28  ;;  %v638_v40 = vunpack.c.l.b16 %v588_v37  ;;  %v906_v33 = vpop.f32.mrf.mxu2  ;;  %v2632_v37 = vld [vmem:[%s2719_s4] ss:$0 sm:$0xff] }
  0xe5   : > { %886 = vmatmul.bf16.vlgmr.msrb.gmra.mxu3 %v658_v35 }
  0xe6   : > { %v581_v36 = vpop.f32.mrf.mxu3 }
  0xe7   : > { %v600_v41 = vpack.c.bf16 %v581_v36, %v581_v36 }
  0xe8   : > { %v553_v38 = vpop.f32.mrf.mxu0 }
  0xe9   : > { %v589_v39 = vpack.c.bf16 %v553_v38, %v553_v38  ;;  %v650_v45 = vunpack.c.l.b16 %v600_v41 }
  0xeb   : > { %v639_v42 = vunpack.c.l.b16 %v589_v39  ;;  %v908_v34 = vpop.f32.mrf.mxu2 }
  0xed   : > { %v653_v43 = vpack.c.b16 %v639_v42, %v638_v40 }
  0xee   : > { %v583_v44 = vpop.f32.mrf.mxu3 }
  0xef   : > { %v601_v46 = vpack.c.bf16 %v583_v44, %v583_v44  ;;  %861 = vmatmul.bf16.gmra.mxu1 %v653_v43 }
  0xf0   : > { %v556_v47 = vpop.f32.mrf.mxu0 }
  0xf1   : > { %v651_v48 = vunpack.c.l.b16 %v601_v46  ;;  %v590_v51 = vpack.c.bf16 %v556_v47, %v556_v47 }
  0xf3   : > { %v659_v50 = vpack.c.b16 %v651_v48, %v650_v45  ;;  %v640_v54 = vunpack.c.l.b16 %v590_v51  ;;  %v911_v36 = vpop.f32.mrf.mxu2 }
  0xf5   : > { %891 = vmatmul.bf16.gmra.mxu3 %v659_v50 }
  0xf8   : > { %v558_v52 = vpop.f32.mrf.mxu0 }
  0xf9   : > { %v591_v53 = vpack.c.bf16 %v558_v52, %v558_v52 }
  0xfb   : > { %v641_v55 = vunpack.c.l.b16 %v591_v53  ;;  %v913_v42 = vpop.f32.mrf.mxu2 }
  0xfd   : > { %v654_v56 = vpack.c.b16 %v641_v55, %v640_v54 }
  0xff   : > { %866 = vmatmul.bf16.gmra.mxu1 %v654_v56 }
 0x100   : > { %v561_v57 = vpop.f32.mrf.mxu0 }
 0x101   : > { %v592_v60 = vpack.c.bf16 %v561_v57, %v561_v57 }
 0x103   : > { %v642_v63 = vunpack.c.l.b16 %v592_v60  ;;  %v916_v50 = vpop.f32.mrf.mxu2 }
 0x105   : > { %935 = vmatmul.bf16.vlgmr.msra.gmra.mxu3 %v2036_v58 }
 0x108   : > { %v563_v61 = vpop.f32.mrf.mxu0 }
 0x109   : > { %v593_v62 = vpack.c.bf16 %v563_v61, %v563_v61 }
 0x10b   : > { %v643_v0 = vunpack.c.l.b16 %v593_v62  ;;  %v918_v59 = vpop.f32.mrf.mxu2 }
 0x10d   : > { %v655_v2 = vpack.c.b16 %v643_v0, %v642_v63 }
 0x10f   : > { %871 = vmatmul.bf16.gmra.mxu1 %v655_v2 }
 0x110   : > { %v566_v4 = vpop.f32.mrf.mxu0 }
 0x111   : > { %v594_v8 = vpack.c.bf16 %v566_v4, %v566_v4 }
 0x113   : > { %v644_v14 = vunpack.c.l.b16 %v594_v8  ;;  %v921_v2 = vpop.f32.mrf.mxu2 }
 0x115   : > { %940 = vmatmul.bf16.gmra.mxu3 %v2037_v6 }
 0x118   : > { %v568_v10 = vpop.f32.mrf.mxu0 }
 0x119   : > { %v595_v12 = vpack.c.bf16 %v568_v10, %v568_v10 }
 0x11b   : > { %v645_v16 = vunpack.c.l.b16 %v595_v12 }
 0x11d   : > { %v656_v18 = vpack.c.b16 %v645_v16, %v644_v14 }
 0x11f   : > { %876 = vmatmul.bf16.gmra.mxu1 %v656_v18 }
 0x120   : > { %v571_v20 = vpop.f32.mrf.mxu0 }
 0x121   : > { %v596_v22 = vpack.c.bf16 %v571_v20, %v571_v20 }
 0x123   : > { %v646_v28 = vunpack.c.l.b16 %v596_v22  ;;  %v923_v22 = vpop.f32.mrf.mxu2 }
 0x128   : > { %v573_v24 = vpop.f32.mrf.mxu0 }
 0x129   : > { %v597_v26 = vpack.c.bf16 %v573_v24, %v573_v24 }
 0x12b   : > { %v647_v30 = vunpack.c.l.b16 %v597_v26 }
 0x12d   : > { %v657_v32 = vpack.c.b16 %v647_v30, %v646_v28 }
 0x12f   : > { %881 = vmatmul.bf16.gmra.mxu1 %v657_v32 }
 0x15c   : > { %v857_v35 = vpop.f32.mrf.mxu1 }
 0x15d   : > { %v858_v38 = vadd.f32 %v2632_v37, %v857_v35 }
 0x15f   : > { %v907_v40 = vadd.f32 %v906_v33, %v858_v38 }
 0x161   : > { %v946_v45 = vmax.f32 %v907_v40, 0.0 }
 0x164   : > { %v859_v39 = vpop.f32.mrf.mxu1 }
 0x165   : > { %v860_v41 = vadd.f32 %v2632_v37, %v859_v39 }
 0x167   : > { %v909_v43 = vadd.f32 %v908_v34, %v860_v41  ;;  %v926_v41 = vpop.f32.mrf.mxu2 }
 0x168   : > { %v887_v44 = vpop.f32.mrf.mxu3 }
 0x169   : > { %v947_v46 = vmax.f32 %v909_v43, 0.0  ;;  %v888_v20 = vadd.f32 %v2632_v37, %v887_v44 }
 0x16b   : > { %v2089_v47 = vpack.c.bf16 %v947_v46, %v946_v45 }
 0x16c   : > { %v862_v48 = vpop.f32.mrf.mxu1 }
 0x16d   : > { %2090 = vst [vmem:[#allocation2 + $0x30] sm:$0xff] %v2089_v47   ;;  %v863_v51 = vadd.f32 %v2632_v37, %v862_v48 }
 0x16f   : > { %v912_v53 = vadd.f32 %v911_v36, %v863_v51 }
 0x170   : > { %v889_v49 = vpop.f32.mrf.mxu3 }
 0x171   : > { %v948_v57 = vmax.f32 %v912_v53, 0.0  ;;  %v890_v24 = vadd.f32 %v2632_v37, %v889_v49  ;;  %v928_v53 = vpop.f32.mrf.mxu2 }
 0x174   : > { %v864_v52 = vpop.f32.mrf.mxu1 }
 0x175   : > { %v865_v54 = vadd.f32 %v2632_v37, %v864_v52 }
 0x177   : > { %v914_v55 = vadd.f32 %v913_v42, %v865_v54 }
 0x178   : > { %v892_v56 = vpop.f32.mrf.mxu3 }
 0x179   : > { %v949_v58 = vmax.f32 %v914_v55, 0.0  ;;  %v893_v47 = vadd.f32 %v2632_v37, %v892_v56 }
 0x17b   : > { %v2094_v60 = vpack.c.bf16 %v949_v58, %v948_v57 }
 0x17c   : > { %v867_v61 = vpop.f32.mrf.mxu1 }
 0x17d   : > { %2126 = vst [vmem:[#allocation2] sm:$0xff] %v2094_v60   ;;  %v868_v63 = vadd.f32 %v2632_v37, %v867_v61 }
 0x17f   : > { %v917_v4 = vadd.f32 %v916_v50, %v868_v63 }
 0x180   : > { %v894_v62 = vpop.f32.mrf.mxu3 }
 0x181   : > { %v950_v12 = vmax.f32 %v917_v4, 0.0  ;;  %v895_v48 = vadd.f32 %v2632_v37, %v894_v62 }
 0x184   : > { %v869_v0 = vpop.f32.mrf.mxu1 }
 0x185   : > { %v870_v6 = vadd.f32 %v2632_v37, %v869_v0 }
 0x187   : > { %v919_v8 = vadd.f32 %v918_v59, %v870_v6 }
 0x188   : > { %v936_v10 = vpop.f32.mrf.mxu3 }
 0x189   : > { %v951_v14 = vmax.f32 %v919_v8, 0.0  ;;  %v937_v26 = vadd.f32 %v936_v10, %v888_v20 }
 0x18b   : > { %v2099_v16 = vpack.c.bf16 %v951_v14, %v950_v12  ;;  %v958_v33 = vmax.f32 %v937_v26, 0.0 }
 0x18c   : > { %v872_v18 = vpop.f32.mrf.mxu1 }
 0x18d   : > { %2127 = vst [vmem:[#allocation2 + $0x18] sm:$0xff] %v2099_v16   ;;  %v873_v30 = vadd.f32 %v2632_v37, %v872_v18 }
 0x18f   : > { %v922_v36 = vadd.f32 %v921_v2, %v873_v30  ;;  %v931_v2 = vpop.f32.mrf.mxu2 }
 0x190   : > { %v938_v28 = vpop.f32.mrf.mxu3 }
 0x191   : > { %v939_v32 = vadd.f32 %v938_v28, %v890_v24  ;;  %v952_v43 = vmax.f32 %v922_v36, 0.0 }
 0x193   : > { %v959_v34 = vmax.f32 %v939_v32, 0.0 }
 0x194   : > { %v874_v35 = vpop.f32.mrf.mxu1 }
 0x195   : > { %v2119_v38 = vpack.c.bf16 %v959_v34, %v958_v33  ;;  %v875_v39 = vadd.f32 %v2632_v37, %v874_v35 }
 0x197   : > { %2131 = vst [vmem:[#allocation2 + $0x28] sm:$0xff] %v2119_v38   ;;  %v924_v40 = vadd.f32 %v923_v22, %v875_v39  ;;  %v933_v12 = vpop.f32.mrf.mxu2 }
 0x198   : > { %v941_v42 = vpop.f32.mrf.mxu3 }
 0x199   : > { %v953_v44 = vmax.f32 %v924_v40, 0.0  ;;  %v942_v49 = vadd.f32 %v941_v42, %v893_v47 }
 0x19b   : > { %v2104_v45 = vpack.c.bf16 %v953_v44, %v952_v43  ;;  %v960_v54 = vmax.f32 %v942_v49, 0.0 }
 0x19c   : > { %v877_v46 = vpop.f32.mrf.mxu1 }
 0x19d   : > { %2128 = vst [vmem:[#allocation2 + $0x10] sm:$0xff] %v2104_v45   ;;  %v878_v51 = vadd.f32 %v2632_v37, %v877_v46 }
 0x19f   : > { %v927_v58 = vadd.f32 %v926_v41, %v878_v51 }
 0x1a0   : > { %v943_v50 = vpop.f32.mrf.mxu3 }
 0x1a1   : > { %v944_v52 = vadd.f32 %v943_v50, %v895_v48  ;;  %v954_v63 = vmax.f32 %v927_v58, 0.0 }
 0x1a3   : > { %v961_v55 = vmax.f32 %v944_v52, 0.0 }
 0x1a4   : > { %v879_v57 = vpop.f32.mrf.mxu1 }
 0x1a5   : > { %v2124_v59 = vpack.c.bf16 %v961_v55, %v960_v54  ;;  %v880_v60 = vadd.f32 %v2632_v37, %v879_v57 }
 0x1a7   : > { %2132 = vst [vmem:[#allocation2 + $0x38] sm:$0xff] %v2124_v59   ;;  %v929_v61 = vadd.f32 %v928_v53, %v880_v60 }
 0x1a9   : > { %v955_v56 = vmax.f32 %v929_v61, 0.0 }
 0x1ab   : > { %v2109_v0 = vpack.c.bf16 %v955_v56, %v954_v63 }
 0x1ac   : > { %v882_v62 = vpop.f32.mrf.mxu1 }
 0x1ad   : > { %2129 = vst [vmem:[#allocation2 + $0x8] sm:$0xff] %v2109_v0   ;;  %v883_v4 = vadd.f32 %v2632_v37, %v882_v62 }
 0x1af   : > { %v932_v8 = vadd.f32 %v931_v2, %v883_v4 }
 0x1b1   : > { %v956_v16 = vmax.f32 %v932_v8, 0.0 }
 0x1b4   : > { %v884_v6 = vpop.f32.mrf.mxu1 }
 0x1b5   : > { %v885_v10 = vadd.f32 %v2632_v37, %v884_v6 }
 0x1b7   : > { %v934_v14 = vadd.f32 %v933_v12, %v885_v10 }
 0x1b9   : > { %v957_v18 = vmax.f32 %v934_v14, 0.0 }
 0x1bb   : > { %v2114_v20 = vpack.c.bf16 %v957_v18, %v956_v16 }
 0x1bd   : > { %2130 = vst [vmem:[#allocation2 + $0x20] sm:$0xff] %v2114_v20  }
 0x1be PF: > { %p1843_p8 = scmp.ne.s32.totalorder %s2438_s11, 1 }
 0x1c0   : > { %999 = sbr.rel (%p1843_p8) target bundleno = 1145 (0x479), region = 84 }
 0x1c5   : > { %v2061_v22 = vld [vmem:[#allocation2 + $0x38] sm:$0xff]  ;;  %v2060_v24 = vld [vmem:[#allocation2 + $0x28] sm:$0xff]  ;;  %v2059_v26 = vld [vmem:[#allocation2 + $0x20] sm:$0xff]  ;;  %v1851_v34 = vor.u32 %v2590_v7, %v2588_v5  ;;  %v1855_v35 = vor.u32 %v2594_v11, %v2592_v9  ;;  %v1859_v36 = vor.u32 %v2598_v15, %v2596_v13  ;;  %v1863_v38 = vor.u32 %v2604_v19, %v2600_v17 }
 0x1c6   : > { %2157 = vmatpush.bf16.msra.mxu3 %v2061_v22  ;;  %1117 = vmatpush.bf16.msra.mxu0 %v2061_v22  ;;  %v2058_v28 = vld [vmem:[#allocation2 + $0x8] sm:$0xff]  ;;  %v2057_v37 = vld [vmem:[#allocation2 + $0x10] sm:$0xff]  ;;  %v2056_v30 = vld [vmem:[#allocation2 + $0x18] sm:$0xff]  ;;  %v1847_v39 = vor.u32 %v2586_v3, %v2584_v1  ;;  %v1867_v5 = vor.u32 %v2612_v23, %v2608_v21  ;;  %v1871_v3 = vor.u32 %v2618_v27, %v2616_v25  ;;  %vm1582_vm0 = vcmask 7168  }
 0x1c7   : > { %v2055_v32 = vld [vmem:[#allocation2] sm:$0xff]  ;;  %v2054_v33 = vld [vmem:[#allocation2 + $0x30] sm:$0xff]  ;;  %v1875_v41 = vor.u32 %v2622_v31, %v2620_v29  ;;  %v2064_v46 = vld [vmem:[#allocation2 + $0x18] sm:$0xff] }
 0x1c8   : > { %v2085_v7 = vld [vmem:[#allocation12 + $0x78] sm:$0xff]  ;;  %v2084_v9 = vld [vmem:[#allocation12 + $0x70] sm:$0xff]  ;;  %v2083_v13 = vld [vmem:[#allocation12 + $0x68] sm:$0xff] }
 0x1c9   : > { %v2077_v40 = vld [vmem:[#allocation12 + $0x38] sm:$0xff]  ;;  %2173 = vmatpush.bf16.msra.mxu2 %v2085_v7  ;;  %v2076_v11 = vld [vmem:[#allocation12 + $0x30] sm:$0xff]  ;;  %v2075_v15 = vld [vmem:[#allocation12 + $0x28] sm:$0xff] }
 0x1ca   : > { %2158 = vmatpush.bf16.msra.mxu3 %v2060_v24  ;;  %1118 = vmatpush.bf16.msra.mxu0 %v2060_v24  ;;  %v2082_v17 = vld [vmem:[#allocation12 + $0x60] sm:$0xff]  ;;  %v2081_v19 = vld [vmem:[#allocation12 + $0x58] sm:$0xff]  ;;  %v2080_v21 = vld [vmem:[#allocation12 + $0x50] sm:$0xff] }
 0x1cb   : > { %2165 = vmatpush.bf16.msra.mxu1 %v2077_v40  ;;  %v2074_v1 = vld [vmem:[#allocation12 + $0x20] sm:$0xff]  ;;  %v2079_v23 = vld [vmem:[#allocation12 + $0x48] sm:$0xff]  ;;  %v2073_v42 = vld [vmem:[#allocation12 + $0x18] sm:$0xff] }
 0x1cc   : > { %v2078_v43 = vld [vmem:[#allocation12 + $0x40] sm:$0xff]  ;;  %v2063_v44 = vld [vmem:[#allocation2] sm:$0xff]  ;;  %v2071_v27 = vld [vmem:[#allocation12 + $0x8] sm:$0xff] }
 0x1cd   : > { %2174 = vmatpush.bf16.msra.mxu2 %v2084_v9  ;;  %v2072_v25 = vld [vmem:[#allocation12 + $0x10] sm:$0xff]  ;;  %v2070_v45 = vld [vmem:[#allocation12] sm:$0xff] }
 0x1ce   : > { %2159 = vmatpush.bf16.msra.mxu3 %v2059_v26  ;;  %1119 = vmatpush.bf16.msra.mxu0 %v2059_v26  ;;  %v2065_v31 = vld [vmem:[#allocation2 + $0x10] sm:$0xff]  ;;  %v2066_v54 = vld [vmem:[#allocation2 + $0x8] sm:$0xff]  ;;  %v2067_v56 = vld [vmem:[#allocation2 + $0x20] sm:$0xff] }
 0x1cf   : > { %2166 = vmatpush.bf16.msra.mxu1 %v2076_v11  ;;  %v2068_v14 = vld [vmem:[#allocation2 + $0x28] sm:$0xff] }
 0x1d1   : > { %2175 = vmatpush.bf16.msra.mxu2 %v2083_v13 }
 0x1d2   : > { %2160 = vmatpush.bf16.msra.mxu3 %v2058_v28  ;;  %1120 = vmatpush.bf16.msra.mxu0 %v2058_v28 }
 0x1d3   : > { %2167 = vmatpush.bf16.msra.mxu1 %v2075_v15 }
 0x1d5   : > { %2176 = vmatpush.bf16.msra.mxu2 %v2082_v17 }
 0x1d6   : > { %2161 = vmatpush.bf16.msra.mxu3 %v2057_v37  ;;  %1121 = vmatpush.bf16.msra.mxu0 %v2057_v37 }
 0x1d7   : > { %2168 = vmatpush.bf16.msra.mxu1 %v2074_v1 }
 0x1d9   : > { %2177 = vmatpush.bf16.msra.mxu2 %v2081_v19 }
 0x1da   : > { %2162 = vmatpush.bf16.msra.mxu3 %v2056_v30  ;;  %1122 = vmatpush.bf16.msra.mxu0 %v2056_v30 }
 0x1db   : > { %2169 = vmatpush.bf16.msra.mxu1 %v2073_v42 }
 0x1dd   : > { %2178 = vmatpush.bf16.msra.mxu2 %v2080_v21 }
 0x1de   : > { %2163 = vmatpush.bf16.msra.mxu3 %v2055_v32  ;;  %1123 = vmatpush.bf16.msra.mxu0 %v2055_v32 }
 0x1df   : > { %2170 = vmatpush.bf16.msra.mxu1 %v2072_v25 }
 0x1e1   : > { %2179 = vmatpush.bf16.msra.mxu2 %v2079_v23 }
 0x1e2   : > { %2164 = vmatpush.bf16.msra.mxu3 %v2054_v33  ;;  %1124 = vmatpush.bf16.msra.mxu0 %v2054_v33 }
 0x1e3   : > { %2171 = vmatpush.bf16.msra.mxu1 %v2071_v27 }
 0x1e5   : > { %1130 = vmatmul.bf16.vlgmr.msra.gmra.mxu3 %v1851_v34  ;;  %1125 = vmatmul.bf16.vlgmr.msra.gmra.mxu0 %v1847_v39 }
 0x1e6   : > { %1428 = vmatpush.bf16.msrb.mxu0 %v2077_v40  ;;  %2180 = vmatpush.bf16.msra.mxu2 %v2078_v43 }
 0x1e7   : > { %2172 = vmatpush.bf16.msra.mxu1 %v2070_v45 }
 0x1e9   : > { %1490 = vmatmul.bf16.vlgmr.msra.gmra.mxu2 %v2063_v44 }
 0x1ea   : > { %1429 = vmatpush.bf16.msrb.mxu0 %v2076_v11  ;;  %v2062_v11 = vld [vmem:[#allocation2 + $0x30] sm:$0xff] }
 0x1ee   : > { %1430 = vmatpush.bf16.msrb.mxu0 %v2075_v15 }
 0x1f2   : > { %1431 = vmatpush.bf16.msrb.mxu0 %v2074_v1 }
 0x1f5   : > { %1135 = vmatmul.bf16.gmra.mxu3 %v1855_v35 }
 0x1f6   : > { %1432 = vmatpush.bf16.msrb.mxu0 %v2073_v42 }
 0x1f9   : > { %1495 = vmatmul.bf16.gmra.mxu2 %v2064_v46 }
 0x1fa   : > { %1433 = vmatpush.bf16.msrb.mxu0 %v2072_v25 }
 0x1fe   : > { %1434 = vmatpush.bf16.msrb.mxu0 %v2071_v27 }
 0x202   : > { %1435 = vmatpush.bf16.msrb.mxu0 %v2070_v45 }
 0x205   : > { %1140 = vmatmul.bf16.gmra.mxu3 %v1859_v36  ;;  %v2069_v36 = vld [vmem:[#allocation2 + $0x38] sm:$0xff] }
 0x206   : > { %1477 = vmatpush.bf16.msra.mxu0 %v2085_v7 }
 0x209   : > { %1500 = vmatmul.bf16.gmra.mxu2 %v2065_v31  ;;  %v2670_v31 = vld [vmem:[%s2721_s6] ss:$0 sm:$0xff] }
 0x20a   : > { %1478 = vmatpush.bf16.msra.mxu0 %v2084_v9 }
 0x20e   : > { %1479 = vmatpush.bf16.msra.mxu0 %v2083_v13 }
 0x212   : > { %1480 = vmatpush.bf16.msra.mxu0 %v2082_v17 }
 0x215   : > { %1145 = vmatmul.bf16.gmra.mxu3 %v1863_v38 }
 0x216   : > { %1481 = vmatpush.bf16.msra.mxu0 %v2081_v19 }
 0x219   : > { %1505 = vmatmul.bf16.gmra.mxu2 %v2066_v54 }
 0x21a   : > { %1482 = vmatpush.bf16.msra.mxu0 %v2080_v21 }
 0x21e   : > { %1483 = vmatpush.bf16.msra.mxu0 %v2079_v23 }
 0x222   : > { %1484 = vmatpush.bf16.msra.mxu0 %v2078_v43 }
 0x225   : > { %1150 = vmatmul.bf16.gmra.mxu3 %v1867_v5 }
 0x229   : > { %1510 = vmatmul.bf16.gmra.mxu2 %v2067_v56 }
 0x235   : > { %1155 = vmatmul.bf16.gmra.mxu3 %v1871_v3 }
 0x239   : > { %1515 = vmatmul.bf16.gmra.mxu2 %v2068_v14 }
 0x245   : > { %1160 = vmatmul.bf16.gmra.mxu3 %v1875_v41 }
 0x249   : > { %1520 = vmatmul.bf16.gmra.mxu2 %v2069_v36 }
 0x262   : > { %v1126_v10 = vpop.f32.mrf.mxu0 }
 0x263   : > { %v1166_v16 = vpack.c.bf16 %v1126_v10, %v1126_v10 }
 0x265   : > { %v1216_v24 = vunpack.c.l.b16 %v1166_v16 }
 0x268   : > { %v1131_v29 = vpop.f32.mrf.mxu3 }
 0x269   : > { %v1168_v47 = vpack.c.bf16 %v1131_v29, %v1131_v29 }
 0x26a   : > { %v1128_v20 = vpop.f32.mrf.mxu0 }
 0x26b   : > { %v1218_v50 = vunpack.c.l.b16 %v1168_v47  ;;  %v1167_v26 = vpack.c.bf16 %v1128_v20, %v1128_v20 }
 0x26c   : > { %v1491_v45 = vpop.f32.mrf.mxu2 }
 0x26d   : > { %v1217_v37 = vunpack.c.l.b16 %v1167_v26 }
 0x26f   : > { %v1232_v33 = vpack.c.b16 %v1217_v37, %v1216_v24 }
 0x270   : > { %v1133_v48 = vpop.f32.mrf.mxu3 }
 0x271   : > { %v1169_v49 = vpack.c.bf16 %v1133_v48, %v1133_v48  ;;  %1436 = vmatmul.bf16.vlgmr.msrb.gmra.mxu0 %v1232_v33 }
 0x273   : > { %v1219_v51 = vunpack.c.l.b16 %v1169_v49 }
 0x274   : > { %v1493_v46 = vpop.f32.mrf.mxu2 }
 0x275   : > { %v1233_v52 = vpack.c.b16 %v1219_v51, %v1218_v50 }
 0x277   : > { %1441 = vmatmul.bf16.vlgmr.msra.gmra.mxu1 %v1233_v52 }
 0x278   : > { %v1136_v53 = vpop.f32.mrf.mxu3 }
 0x279   : > { %v1170_v55 = vpack.c.bf16 %v1136_v53, %v1136_v53 }
 0x27b   : > { %v1220_v59 = vunpack.c.l.b16 %v1170_v55 }
 0x27c   : > { %v1496_v29 = vpop.f32.mrf.mxu2 }
 0x280   : > { %v1138_v57 = vpop.f32.mrf.mxu3 }
 0x281   : > { %v1171_v58 = vpack.c.bf16 %v1138_v57, %v1138_v57  ;;  %1485 = vmatmul.bf16.vlgmr.msra.gmra.mxu0 %v2062_v11 }
 0x283   : > { %v1221_v60 = vunpack.c.l.b16 %v1171_v58 }
 0x284   : > { %v1498_v50 = vpop.f32.mrf.mxu2 }
 0x285   : > { %v1234_v61 = vpack.c.b16 %v1221_v60, %v1220_v59 }
 0x287   : > { %1446 = vmatmul.bf16.gmra.mxu1 %v1234_v61 }
 0x288   : > { %v1141_v63 = vpop.f32.mrf.mxu3 }
 0x289   : > { %v1172_v0 = vpack.c.bf16 %v1141_v63, %v1141_v63 }
 0x28b   : > { %v1222_v4 = vunpack.c.l.b16 %v1172_v0 }
 0x28c   : > { %v1501_v55 = vpop.f32.mrf.mxu2 }
 0x290   : > { %v1143_v2 = vpop.f32.mrf.mxu3 }
 0x291   : > { %v1173_v62 = vpack.c.bf16 %v1143_v2, %v1143_v2 }
 0x293   : > { %v1223_v6 = vunpack.c.l.b16 %v1173_v62 }
 0x294   : > { %v1503_v61 = vpop.f32.mrf.mxu2 }
 0x295   : > { %v1235_v8 = vpack.c.b16 %v1223_v6, %v1222_v4 }
 0x297   : > { %1451 = vmatmul.bf16.gmra.mxu1 %v1235_v8 }
 0x298   : > { %v1146_v12 = vpop.f32.mrf.mxu3 }
 0x299   : > { %v1174_v18 = vpack.c.bf16 %v1146_v12, %v1146_v12 }
 0x29b   : > { %v1224_v30 = vunpack.c.l.b16 %v1174_v18 }
 0x29c   : > { %v1506_v62 = vpop.f32.mrf.mxu2 }
 0x2a0   : > { %v1148_v22 = vpop.f32.mrf.mxu3 }
 0x2a1   : > { %v1175_v28 = vpack.c.bf16 %v1148_v22, %v1148_v22 }
 0x2a3   : > { %v1225_v32 = vunpack.c.l.b16 %v1175_v28 }
 0x2a4   : > { %v1508_v10 = vpop.f32.mrf.mxu2 }
 0x2a5   : > { %v1236_v34 = vpack.c.b16 %v1225_v32, %v1224_v30 }
 0x2a7   : > { %1456 = vmatmul.bf16.gmra.mxu1 %v1236_v34 }
 0x2a8   : > { %v1151_v35 = vpop.f32.mrf.mxu3 }
 0x2a9   : > { %v1176_v38 = vpack.c.bf16 %v1151_v35, %v1151_v35 }
 0x2ab   : > { %v1226_v7 = vunpack.c.l.b16 %v1176_v38 }
 0x2ac   : > { %v1511_v20 = vpop.f32.mrf.mxu2 }
 0x2b0   : > { %v1153_v39 = vpop.f32.mrf.mxu3 }
 0x2b1   : > { %v1177_v5 = vpack.c.bf16 %v1153_v39, %v1153_v39 }
 0x2b3   : > { %v1227_v40 = vunpack.c.l.b16 %v1177_v5 }
 0x2b4   : > { %v1513_v24 = vpop.f32.mrf.mxu2 }
 0x2b5   : > { %v1237_v9 = vpack.c.b16 %v1227_v40, %v1226_v7 }
 0x2b7   : > { %1461 = vmatmul.bf16.gmra.mxu1 %v1237_v9 }
 0x2b8   : > { %v1156_v13 = vpop.f32.mrf.mxu3 }
 0x2b9   : > { %v1178_v15 = vpack.c.bf16 %v1156_v13, %v1156_v13 }
 0x2bb   : > { %v1228_v3 = vunpack.c.l.b16 %v1178_v15 }
 0x2bc   : > { %v1516_v28 = vpop.f32.mrf.mxu2 }
 0x2c0   : > { %v1158_v17 = vpop.f32.mrf.mxu3 }
 0x2c1   : > { %v1179_v1 = vpack.c.bf16 %v1158_v17, %v1158_v17 }
 0x2c3   : > { %v1229_v19 = vunpack.c.l.b16 %v1179_v1 }
 0x2c4   : > { %v1518_v30 = vpop.f32.mrf.mxu2 }
 0x2c5   : > { %v1238_v21 = vpack.c.b16 %v1229_v19, %v1228_v3 }
 0x2c7   : > { %1466 = vmatmul.bf16.gmra.mxu1 %v1238_v21 }
 0x2c8   : > { %v1161_v23 = vpop.f32.mrf.mxu3 }
 0x2c9   : > { %v1180_v41 = vpack.c.bf16 %v1161_v23, %v1161_v23 }
 0x2cb   : > { %v1230_v44 = vunpack.c.l.b16 %v1180_v41 }
 0x2cc   : > { %v1521_v33 = vpop.f32.mrf.mxu2 }
 0x2d0   : > { %v1163_v42 = vpop.f32.mrf.mxu3 }
 0x2d1   : > { %v1181_v43 = vpack.c.bf16 %v1163_v42, %v1163_v42 }
 0x2d3   : > { %v1231_v25 = vunpack.c.l.b16 %v1181_v43 }
 0x2d4   : > { %v1523_v7 = vpop.f32.mrf.mxu2 }
 0x2d5   : > { %v1239_v27 = vpack.c.b16 %v1231_v25, %v1230_v44 }
 0x2d7   : > { %1471 = vmatmul.bf16.gmra.mxu1 %v1239_v27 }
 0x2ee   : > { %v1437_v35 = vpop.f32.mrf.mxu0 }
 0x2f4   : > { %v1442_v47 = vpop.f32.mrf.mxu1 }
 0x2f5   : > { %v1443_v48 = vadd.f32 %v2670_v31, %v1442_v47 }
 0x2f6   : > { %v1439_v1 = vpop.f32.mrf.mxu0 }
 0x2f7   : > { %v2673_v49 = vadd.f32 %v1491_v45, %v1443_v48 }
 0x2fc   : > { %v1444_v51 = vpop.f32.mrf.mxu1 }
 0x2fd   : > { %v1445_v52 = vadd.f32 %v2670_v31, %v1444_v51 }
 0x2ff   : > { %v2676_v53 = vadd.f32 %v1493_v46, %v1445_v52  ;;  %v1486_v46 = vpop.f32.mrf.mxu0  ;;  %v1440_v52 = vadd.f32 %v2670_v31, %v1439_v1 }
 0x304   : > { %v1447_v54 = vpop.f32.mrf.mxu1 }
 0x305   : > { %v1448_v57 = vadd.f32 %v2670_v31, %v1447_v54 }
 0x307   : > { %v2679_v58 = vadd.f32 %v1496_v29, %v1448_v57  ;;  %v1488_v54 = vpop.f32.mrf.mxu0  ;;  %v1438_v57 = vadd.f32 %v2670_v31, %v1437_v35 }
 0x30c   : > { %v1449_v59 = vpop.f32.mrf.mxu1 }
 0x30d   : > { %v1450_v60 = vadd.f32 %v2670_v31, %v1449_v59  ;;  %v1529_v59 = vmax.f32 %v2676_v53, 0.0  ;;  %v2261_v53 = vld [vmem:[#allocation4] ss:$0 sm:$0xff] }
 0x30f   : > { %v2682_v63 = vadd.f32 %v1498_v50, %v1450_v60  ;;  %v1489_v60 = vadd.f32 %v1488_v54, %v1440_v52 }
 0x311   : > { %v1531_v51 = vmax.f32 %v2682_v63, 0.0 }
 0x314   : > { %v1452_v56 = vpop.f32.mrf.mxu1 }
 0x315   : > { %v1453_v0 = vadd.f32 %v2670_v31, %v1452_v56  ;;  %v1487_v56 = vadd.f32 %v1486_v46, %v1438_v57 }
 0x317   : > { %v1502_v2 = vadd.f32 %v1501_v55, %v1453_v0  ;;  %v1530_v55 = vmax.f32 %v2679_v58, 0.0  ;;  %v1527_v0 = vmax.f32 %v1489_v60, 0.0  ;;  %v1526_v63 = vmax.f32 %v1487_v56, 0.0 }
 0x319   : > { %v1532_v50 = vmax.f32 %v1502_v2, 0.0  ;;  %v1543_v2 = vld [vmem:[#allocation9] sm:$0xff] }
 0x31c   : > { %v1454_v4 = vpop.f32.mrf.mxu1 }
 0x31d   : > { %v1455_v6 = vadd.f32 %v2670_v31, %v1454_v4 }
 0x31f   : > { %v1504_v8 = vadd.f32 %v1503_v61, %v1455_v6  ;;  %v1528_v61 = vmax.f32 %v2673_v49, 0.0 }
 0x321   : > { %v1533_v48 = vmax.f32 %v1504_v8, 0.0 }
 0x324   : > { %v1457_v12 = vpop.f32.mrf.mxu1 }
 0x325   : > { %v1458_v14 = vadd.f32 %v2670_v31, %v1457_v12 }
 0x327   : > { %v1507_v16 = vadd.f32 %v1506_v62, %v1458_v14 }
 0x329   : > { %v1534_v47 = vmax.f32 %v1507_v16, 0.0 }
 0x32c   : > { %v1459_v18 = vpop.f32.mrf.mxu1 }
 0x32d   : > { %v1460_v23 = vadd.f32 %v2670_v31, %v1459_v18 }
 0x32f   : > { %v1509_v25 = vadd.f32 %v1508_v10, %v1460_v23 }
 0x331   : > { %v1535_v29 = vmax.f32 %v1509_v25, 0.0 }
 0x334   : > { %v1462_v22 = vpop.f32.mrf.mxu1 }
 0x335   : > { %v1463_v3 = vadd.f32 %v2670_v31, %v1462_v22 }
 0x337   : > { %v1512_v43 = vadd.f32 %v1511_v20, %v1463_v3 }
 0x339   : > { %v1536_v45 = vmax.f32 %v1512_v43, 0.0 }
 0x33c   : > { %v1464_v26 = vpop.f32.mrf.mxu1 }
 0x33d   : > { %v1465_v13 = vadd.f32 %v2670_v31, %v1464_v26 }
 0x33f   : > { %v1514_v41 = vadd.f32 %v1513_v24, %v1465_v13 }
 0x341   : > { %v1537_v27 = vmax.f32 %v1514_v41, 0.0 }
 0x344   : > { %v1467_v37 = vpop.f32.mrf.mxu1 }
 0x345   : > { %v1468_v40 = vadd.f32 %v2670_v31, %v1467_v37 }
 0x347   : > { %v1517_v19 = vadd.f32 %v1516_v28, %v1468_v40 }
 0x349   : > { %v1538_v44 = vmax.f32 %v1517_v19, 0.0 }
 0x34c   : > { %v1469_v32 = vpop.f32.mrf.mxu1 }
 0x34d   : > { %v1470_v39 = vadd.f32 %v2670_v31, %v1469_v32 }
 0x34f   : > { %v1519_v15 = vadd.f32 %v1518_v30, %v1470_v39 }
 0x351   : > { %v1539_v42 = vmax.f32 %v1519_v15, 0.0 }
 0x354   : > { %v1472_v34 = vpop.f32.mrf.mxu1 }
 0x355   : > { %v1473_v36 = vadd.f32 %v2670_v31, %v1472_v34 }
 0x357   : > { %v1522_v9 = vadd.f32 %v1521_v33, %v1473_v36 }
 0x359   : > { %v1540_v21 = vmax.f32 %v1522_v9, 0.0 }
 0x35c   : > { %v1474_v38 = vpop.f32.mrf.mxu1 }
 0x35d   : > { %v1475_v5 = vadd.f32 %v2670_v31, %v1474_v38  ;;  %v2260_v31 = vld [vmem:[%s2722_s7] ss:$0 sm:$0xff] }
 0x35f   : > { %v1524_v11 = vadd.f32 %v1523_v7, %v1475_v5 }
 0x361   : > { %v1541_v17 = vmax.f32 %v1524_v11, 0.0 }
 0x363   : > { %1544 = vmatpush.msrb.mxu0 %v1541_v17 }
 0x365   : > { %1545 = vmatpush.msrb.mxu0 %v1540_v21 }
 0x367   : > { %1546 = vmatpush.msrb.mxu0 %v1539_v42 }
 0x369   : > { %1547 = vmatpush.msrb.mxu0 %v1538_v44 }
 0x36b   : > { %1548 = vmatpush.msrb.mxu0 %v1537_v27 }
 0x36d   : > { %1549 = vmatpush.msrb.mxu0 %v1536_v45 }
 0x36f   : > { %1550 = vmatpush.msrb.mxu0 %v1535_v29 }
 0x371   : > { %1551 = vmatpush.msrb.mxu0 %v1534_v47 }
 0x373   : > { %1552 = vmatpush.msrb.mxu0 %v1533_v48 }
 0x375   : > { %1553 = vmatpush.msrb.mxu0 %v1532_v50 }
 0x377   : > { %1554 = vmatpush.msrb.mxu0 %v1531_v51 }
 0x379   : > { %1555 = vmatpush.msrb.mxu0 %v1530_v55 }
 0x37b   : > { %1556 = vmatpush.msrb.mxu0 %v1529_v59 }
 0x37d   : > { %1557 = vmatpush.msrb.mxu0 %v1528_v61 }
 0x37f   : > { %1558 = vmatpush.msrb.mxu0 %v1527_v0 }
 0x381   : > { %1559 = vmatpush.msrb.mxu0 %v1526_v63 }
 0x382   : > { %1560 = vmatmul.f32.vlgmr.msrb.gmra.mxu0 %v1543_v2 }
 0x3ff   : > { %v1561_v58 = vpop.f32.mrf.mxu0 }
 0x400   : > { %v1574_v62 = vmul.f32 %v2260_v31, %v1561_v58 }
 0x402   : > { %1575 = vadd.xlane.f32.xlu0 %v1574_v62 }
 0x475   : > { %v1576_v4 = vpop.xlane.xlu0 %1575 }
 0x476   : > { %v1581_v49 = vadd.f32 %v2261_v53, %v1576_v4 }
 0x478   : > { %1583 = vst.msk [vmem:[%s2724_s9] sm:$0xff] %vm1582_vm0, %v1581_v49 }
 0x479 PF: > { %s24_s13 = sadd.s32 1, %s2446_s13   ;;  %s2728_s11 = smov %s2442_s12 }
 0x47a   : > { %p21_p9 = scmp.ge.s32.totalorder %s24_s13, 4   ;;  %s2729_s12 = smov %s2731_s8 }
 0x47c   :  { %23 = sbr.rel (!%p21_p9) target bundleno = 7 (0x7), region = 121 }
 0x481   :  { %1595 = vsyncpa [#allocation6], 1 }
 0x482   :  { %1597 = vsyncpa [#allocation6 + $0x1], 1 }
 0x483   :  { %1598 = vsyncpa [#allocation8], 1 }
 0x484   :  { %1599 = vsyncpa [#allocation11], 1 }

</bundles_post_ra>
